<compile_context>
chip_gen: v7x
topology: tpu7x:2x2x1
jax: 0.10.0
libtpu: 0.0.40
codegen_flags: <defaults>
</compile_context>

<pallas_src>
import jax
import jax.numpy as jnp
from jax.experimental import pallas as pl
from jax.experimental.pallas import tpu as pltpu

D_MODEL = 32
COMPANY_DIM, SECTOR_DIM, MACRO_DIM = 6, 2, 2
TOTAL_IN = COMPANY_DIM + SECTOR_DIM + MACRO_DIM   # 10
PACKED_IN = 16                                    # padded input feature width
W_ROWS = 240                                      # 16 + 32 + 32 + 32 + 96 + 32
OUT_LANES = 128                                   # lane-dense packed output width

PARAM_ORDER = [
    "cw1", "cb1", "cw2", "cb2",      # company encoder
    "sw1", "sb1", "sw2", "sb2",      # sector encoder
    "mw1", "mb1", "mw2", "mb2",      # macro encoder
    "fw1", "fb1", "fw2", "fb2",      # fusion
    "tw0", "tw1", "tw2", "tb",       # temporal conv (3 taps, stored [in, out])
    "iw1", "ib1", "iw2", "ib2",      # impact predictor
]


def _encoder_kernel(x_ref, w_ref, b_ref, out_ref):
    """x_ref: [S, 16] packed features; w_ref: [240, 32]; b_ref: [8, 32];
    out_ref: [S, 128] packed outputs."""
    f32 = jnp.float32
    D = D_MODEL
    x = x_ref[...]                       # [S, 16]
    S = x.shape[0]

    # Static row views into the packed weight slab (row offsets all %8 == 0).
    w_enc1 = w_ref[0:16, :]              # block-diag branch layer 1  [16, 32]
    w_enc2 = w_ref[16:48, :]             # block-diag branch layer 2  [32, 32]
    w_fuse1 = w_ref[48:80, :]            # fusion layer 1             [32, 32]
    w_fuse2 = w_ref[80:112, :]           # fusion layer 2             [32, 32]
    w_temp = w_ref[112:208, :]           # stacked conv taps          [96, 32]
    w_imp1 = w_ref[208:240, :]           # impact layer 1 (cols 16..31 zero)

    b_enc1 = b_ref[0:1, :]
    b_enc2 = b_ref[1:2, :]
    b_fuse1 = b_ref[2:3, :]
    b_fuse2 = b_ref[3:4, :]
    b_temp = b_ref[4:5, :]
    b_imp1 = b_ref[5:6, :]
    w_imp2_row = b_ref[6:7, :]           # final head weight as a row [1, 32]
    b_imp2 = b_ref[7:8, 0:1]             # final head bias            [1, 1]

    def mm(a, w):
        return jnp.dot(a, w, preferred_element_type=f32)

    # ---- branch encoders fused (Linear -> ReLU -> Linear, block-diagonal) ----
    h = jnp.maximum(mm(x, w_enc1) + b_enc1, 0.0)
    combined = mm(h, w_enc2) + b_enc2                 # [S, 32] = [comp|sect|macro]

    # ---- fusion MLP ----
    fh = jnp.maximum(mm(combined, w_fuse1) + b_fuse1, 0.0)
    fused = mm(fh, w_fuse2) + b_fuse2                 # [S, 32]

    # ---- temporal Conv1d(k=3, padding=1): one matmul over [prev | x | next] ----
    zrow = jnp.zeros((1, D), f32)
    prev = jnp.concatenate([zrow, fused[:-1, :]], axis=0)   # x[t-1]
    nxt = jnp.concatenate([fused[1:, :], zrow], axis=0)     # x[t+1]
    conv_in = jnp.concatenate([prev, fused, nxt], axis=-1)  # [S, 96]
    temporal = mm(conv_in, w_temp) + b_temp                 # [S, 32]

    # ---- impact head: Linear -> ReLU -> (VPU dot) -> Sigmoid ----
    imp_h = jnp.maximum(mm(temporal, w_imp1) + b_imp1, 0.0)        # [S, 32]
    score = jax.nn.sigmoid(
        jnp.sum(imp_h * w_imp2_row, axis=-1, keepdims=True) + b_imp2)  # [S, 1]

    # ---- single lane-dense output slab: [temporal(32) | combined(32) | score*64] ----
    out_ref[...] = jnp.concatenate(
        [temporal, combined, jnp.broadcast_to(score, (S, 64))], axis=-1)


def init_params(key, d_model=D_MODEL):
    """Deterministic synthetic parameters. Linear weights stored as [in, out]."""
    half, quarter = d_model // 2, d_model // 4
    shapes = {
        "cw1": (COMPANY_DIM, half), "cb1": (1, half),
        "cw2": (half, half),        "cb2": (1, half),
        "sw1": (SECTOR_DIM, quarter), "sb1": (1, quarter),
        "sw2": (quarter, quarter),    "sb2": (1, quarter),
        "mw1": (MACRO_DIM, quarter),  "mb1": (1, quarter),
        "mw2": (quarter, quarter),    "mb2": (1, quarter),
        "fw1": (d_model, d_model),    "fb1": (1, d_model),
        "fw2": (d_model, d_model),    "fb2": (1, d_model),
        # Conv1d weight W[out, in, k] pre-split per tap, transposed to [in, out]
        "tw0": (d_model, d_model), "tw1": (d_model, d_model), "tw2": (d_model, d_model),
        "tb": (1, d_model),
        "iw1": (d_model, half), "ib1": (1, half),
        "iw2": (half, 1),       "ib2": (1, 1),
    }
    keys = jax.random.split(key, len(PARAM_ORDER))
    params = {}
    for k, name in zip(keys, PARAM_ORDER):
        scale = 0.1 if name[1] == "w" or name.startswith("tw") else 0.01
        params[name] = (scale * jax.random.normal(k, shapes[name])).astype(jnp.float32)
    return params


def _pack_params(p, d_model=D_MODEL):
    """Host-side packing: one [240, 32] weight slab + one [8, 32] bias slab."""
    f32 = jnp.float32
    half, quarter = d_model // 2, d_model // 4

    # Block-diagonal branch-encoder layer 1: [16, 32] (input padded 10 -> 16).
    w_enc1 = jnp.zeros((PACKED_IN, d_model), f32)
    w_enc1 = w_enc1.at[0:COMPANY_DIM, 0:half].set(p["cw1"])
    w_enc1 = w_enc1.at[COMPANY_DIM:COMPANY_DIM + SECTOR_DIM,
                       half:half + quarter].set(p["sw1"])
    w_enc1 = w_enc1.at[COMPANY_DIM + SECTOR_DIM:TOTAL_IN,
                       half + quarter:d_model].set(p["mw1"])
    b_enc1 = jnp.concatenate([p["cb1"], p["sb1"], p["mb1"]], axis=-1)

    # Block-diagonal branch-encoder layer 2: [32, 32].
    w_enc2 = jnp.zeros((d_model, d_model), f32)
    w_enc2 = w_enc2.at[0:half, 0:half].set(p["cw2"])
    w_enc2 = w_enc2.at[half:half + quarter, half:half + quarter].set(p["sw2"])
    w_enc2 = w_enc2.at[half + quarter:, half + quarter:].set(p["mw2"])
    b_enc2 = jnp.concatenate([p["cb2"], p["sb2"], p["mb2"]], axis=-1)

    # Stacked conv taps: [96, 32] so [prev|x|next] @ W == sum of the 3 taps.
    w_temp = jnp.concatenate([p["tw0"], p["tw1"], p["tw2"]], axis=0)

    # Impact head layer 1 padded to 32 output lanes (extra lanes stay 0 thru ReLU).
    w_imp1 = jnp.zeros((d_model, d_model), f32).at[:, 0:half].set(p["iw1"])
    b_imp1 = jnp.zeros((1, d_model), f32).at[:, 0:half].set(p["ib1"])
    w_imp2_row = jnp.zeros((1, d_model), f32).at[:, 0:half].set(p["iw2"].T)
    b_imp2_row = jnp.zeros((1, d_model), f32).at[:, 0:1].set(p["ib2"])

    w_slab = jnp.concatenate(
        [w_enc1, w_enc2, p["fw1"], p["fw2"], w_temp, w_imp1], axis=0)     # [240, 32]
    b_slab = jnp.concatenate(
        [b_enc1, b_enc2, p["fb1"], p["fb2"], p["tb"],
         b_imp1, w_imp2_row, b_imp2_row], axis=0)                         # [8, 32]
    return w_slab, b_slab


def employment_encoder(company, sector, macro, params):
    B, S, _ = company.shape
    D = D_MODEL

    # Pack the three feature streams into one [B, S, 16] input (zeros padding
    # lines up with zero rows of the block-diagonal first-layer weight).
    x = jnp.concatenate(
        [company, sector, macro,
         jnp.zeros((B, S, PACKED_IN - TOTAL_IN), jnp.float32)], axis=-1)

    w_slab, b_slab = _pack_params(params, D)

    out = pl.pallas_call(
        _encoder_kernel,
        out_shape=jax.ShapeDtypeStruct((B, S, OUT_LANES), jnp.float32),
        grid_spec=pltpu.PrefetchScalarGridSpec(
            num_scalar_prefetch=0,
            grid=(B,),
            in_specs=[
                pl.BlockSpec((None, S, PACKED_IN), lambda b: (b, 0, 0)),
                pl.BlockSpec((W_ROWS, D), lambda b: (0, 0)),
                pl.BlockSpec((8, D), lambda b: (0, 0)),
            ],
            out_specs=pl.BlockSpec((None, S, OUT_LANES), lambda b: (b, 0, 0)),
        ),
        compiler_params=pltpu.CompilerParams(dimension_semantics=("parallel",)),
    )(x, w_slab, b_slab)

    # Split the packed output slab (layout: temporal | comp | sect | macro | score).
    return {
        "employment_embeddings": out[..., 0:D],
        "impact_scores": out[..., 2 * D:2 * D + 1],
        "company_features": out[..., D:D + D // 2],
        "sector_features": out[..., D + D // 2:D + 3 * D // 4],
        "macro_features": out[..., D + 3 * D // 4:2 * D],
    }


def reference(company, sector, macro, p):
    """Pure-JAX reference mirroring the PyTorch forward (eval mode)."""
    lin = lambda x, w, b: x @ w + b
    comp = lin(jnp.maximum(lin(company, p["cw1"], p["cb1"]), 0.0), p["cw2"], p["cb2"])
    sect = lin(jnp.maximum(lin(sector, p["sw1"], p["sb1"]), 0.0), p["sw2"], p["sb2"])
    macr = lin(jnp.maximum(lin(macro, p["mw1"], p["mb1"]), 0.0), p["mw2"], p["mb2"])
    combined = jnp.concatenate([comp, sect, macr], axis=-1)
    fused = lin(jnp.maximum(lin(combined, p["fw1"], p["fb1"]), 0.0), p["fw2"], p["fb2"])
    zero = jnp.zeros_like(fused[:, :1, :])
    prev = jnp.concatenate([zero, fused[:, :-1, :]], axis=1)
    nxt = jnp.concatenate([fused[:, 1:, :], zero], axis=1)
    temporal = prev @ p["tw0"] + fused @ p["tw1"] + nxt @ p["tw2"] + p["tb"]
    score = jax.nn.sigmoid(
        lin(jnp.maximum(lin(temporal, p["iw1"], p["ib1"]), 0.0), p["iw2"], p["ib2"])
    )
    return {
        "employment_embeddings": temporal,
        "impact_scores": score,
        "company_features": comp,
        "sector_features": sect,
        "macro_features": macr,
    }


if __name__ == "__main__":
    key = jax.random.PRNGKey(0)
    k_c, k_s, k_m, k_p = jax.random.split(key, 4)

    B, S = 2, 8
    company = jax.random.normal(k_c, (B, S, COMPANY_DIM), dtype=jnp.float32)
    sector = jax.random.normal(k_s, (B, S, SECTOR_DIM), dtype=jnp.float32)
    macro = jax.random.normal(k_m, (B, S, MACRO_DIM), dtype=jnp.float32)
    params = init_params(k_p)

    out = employment_encoder(company, sector, macro, params)
    jax.block_until_ready(out)

    ref = reference(company, sector, macro, params)
    for name in out:
        assert out[name].shape == ref[name].shape, name
        assert jnp.allclose(out[name], ref[name], rtol=1e-3, atol=1e-3), name

    print("KERNEL_OK")
</pallas_src>

<mosaic_0001>
module attributes {stable_mosaic.version = 11 : i64} {
  func.func @_encoder_kernel(%arg0: i32, %arg1: memref<1x8x16xf32, #tpu.memory_space<vmem>>, %arg2: memref<240x32xf32, #tpu.memory_space<vmem>>, %arg3: memref<8x32xf32, #tpu.memory_space<vmem>>, %arg4: memref<1x8x128xf32, #tpu.memory_space<vmem>>) attributes {dimension_semantics = [#tpu.dimension_semantics<parallel>], iteration_bounds = array<i64: 2>, scalar_prefetch = 0 : i64, scratch_operands = 0 : i64, tpu.core_type = #tpu.core_type<tc>, window_params = [{transform_indices = @transform_0, window_bounds = array<i64: 1, 8, 16>}, {pipeline_mode = #tpu.pipeline_mode<synchronous>, transform_indices = @transform_1, window_bounds = array<i64: 240, 32>}, {pipeline_mode = #tpu.pipeline_mode<synchronous>, transform_indices = @transform_2, window_bounds = array<i64: 8, 32>}, {transform_indices = @transform_3, window_bounds = array<i64: 1, 8, 128>}]} {
    %c0 = arith.constant 0 : index
    %c0_0 = arith.constant 0 : index
    %c0_1 = arith.constant 0 : index
    %0 = vector.load %arg1[%c0, %c0_0, %c0_1] : memref<1x8x16xf32, #tpu.memory_space<vmem>>, vector<1x8x16xf32>
    %1 = vector.shape_cast %0 : vector<1x8x16xf32> to vector<8x16xf32>
    %c0_2 = arith.constant 0 : index
    %c0_3 = arith.constant 0 : index
    %2 = vector.load %arg2[%c0_2, %c0_3] : memref<240x32xf32, #tpu.memory_space<vmem>>, vector<16x32xf32>
    %c16 = arith.constant 16 : index
    %c0_4 = arith.constant 0 : index
    %3 = vector.load %arg2[%c16, %c0_4] : memref<240x32xf32, #tpu.memory_space<vmem>>, vector<32x32xf32>
    %c48 = arith.constant 48 : index
    %c0_5 = arith.constant 0 : index
    %4 = vector.load %arg2[%c48, %c0_5] : memref<240x32xf32, #tpu.memory_space<vmem>>, vector<32x32xf32>
    %c80 = arith.constant 80 : index
    %c0_6 = arith.constant 0 : index
    %5 = vector.load %arg2[%c80, %c0_6] : memref<240x32xf32, #tpu.memory_space<vmem>>, vector<32x32xf32>
    %c112 = arith.constant 112 : index
    %c0_7 = arith.constant 0 : index
    %6 = vector.load %arg2[%c112, %c0_7] : memref<240x32xf32, #tpu.memory_space<vmem>>, vector<96x32xf32>
    %c208 = arith.constant 208 : index
    %c0_8 = arith.constant 0 : index
    %7 = vector.load %arg2[%c208, %c0_8] : memref<240x32xf32, #tpu.memory_space<vmem>>, vector<32x32xf32>
    %c0_9 = arith.constant 0 : index
    %c0_10 = arith.constant 0 : index
    %8 = vector.load %arg3[%c0_9, %c0_10] : memref<8x32xf32, #tpu.memory_space<vmem>>, vector<1x32xf32>
    %c1 = arith.constant 1 : index
    %c0_11 = arith.constant 0 : index
    %9 = vector.load %arg3[%c1, %c0_11] : memref<8x32xf32, #tpu.memory_space<vmem>>, vector<1x32xf32>
    %c2 = arith.constant 2 : index
    %c0_12 = arith.constant 0 : index
    %10 = vector.load %arg3[%c2, %c0_12] : memref<8x32xf32, #tpu.memory_space<vmem>>, vector<1x32xf32>
    %c3 = arith.constant 3 : index
    %c0_13 = arith.constant 0 : index
    %11 = vector.load %arg3[%c3, %c0_13] : memref<8x32xf32, #tpu.memory_space<vmem>>, vector<1x32xf32>
    %c4 = arith.constant 4 : index
    %c0_14 = arith.constant 0 : index
    %12 = vector.load %arg3[%c4, %c0_14] : memref<8x32xf32, #tpu.memory_space<vmem>>, vector<1x32xf32>
    %c5 = arith.constant 5 : index
    %c0_15 = arith.constant 0 : index
    %13 = vector.load %arg3[%c5, %c0_15] : memref<8x32xf32, #tpu.memory_space<vmem>>, vector<1x32xf32>
    %c6 = arith.constant 6 : index
    %c0_16 = arith.constant 0 : index
    %14 = vector.load %arg3[%c6, %c0_16] : memref<8x32xf32, #tpu.memory_space<vmem>>, vector<1x32xf32>
    %c7 = arith.constant 7 : index
    %c0_17 = arith.constant 0 : index
    %15 = vector.load %arg3[%c7, %c0_17] : memref<8x32xf32, #tpu.memory_space<vmem>>, vector<1x1xf32>
    %cst = arith.constant dense<0.000000e+00> : vector<8x32xf32>
    %16 = tpu.matmul %1, %2, %cst {dimension_numbers = #tpu.dot_dimension_numbers<[1], [0], [0], [1], [0, 0, 1, 1], [], []>} : vector<8x16xf32>, vector<16x32xf32>, vector<8x32xf32> -> vector<8x32xf32>
    %17 = vector.broadcast %8 : vector<1x32xf32> to vector<8x32xf32>
    %18 = arith.addf %16, %17 : vector<8x32xf32>
    %cst_18 = arith.constant 0.000000e+00 : f32
    %19 = vector.broadcast %cst_18 : f32 to vector<8x32xf32>
    %20 = arith.maximumf %18, %19 : vector<8x32xf32>
    %cst_19 = arith.constant dense<0.000000e+00> : vector<8x32xf32>
    %21 = tpu.matmul %20, %3, %cst_19 {dimension_numbers = #tpu.dot_dimension_numbers<[1], [0], [0], [1], [0, 0, 1, 1], [], []>} : vector<8x32xf32>, vector<32x32xf32>, vector<8x32xf32> -> vector<8x32xf32>
    %22 = vector.broadcast %9 : vector<1x32xf32> to vector<8x32xf32>
    %23 = arith.addf %21, %22 : vector<8x32xf32>
    %cst_20 = arith.constant dense<0.000000e+00> : vector<8x32xf32>
    %24 = tpu.matmul %23, %4, %cst_20 {dimension_numbers = #tpu.dot_dimension_numbers<[1], [0], [0], [1], [0, 0, 1, 1], [], []>} : vector<8x32xf32>, vector<32x32xf32>, vector<8x32xf32> -> vector<8x32xf32>
    %25 = vector.broadcast %10 : vector<1x32xf32> to vector<8x32xf32>
    %26 = arith.addf %24, %25 : vector<8x32xf32>
    %cst_21 = arith.constant 0.000000e+00 : f32
    %27 = vector.broadcast %cst_21 : f32 to vector<8x32xf32>
    %28 = arith.maximumf %26, %27 : vector<8x32xf32>
    %cst_22 = arith.constant dense<0.000000e+00> : vector<8x32xf32>
    %29 = tpu.matmul %28, %5, %cst_22 {dimension_numbers = #tpu.dot_dimension_numbers<[1], [0], [0], [1], [0, 0, 1, 1], [], []>} : vector<8x32xf32>, vector<32x32xf32>, vector<8x32xf32> -> vector<8x32xf32>
    %30 = vector.broadcast %11 : vector<1x32xf32> to vector<8x32xf32>
    %31 = arith.addf %29, %30 : vector<8x32xf32>
    %cst_23 = arith.constant 0.000000e+00 : f32
    %32 = vector.broadcast %cst_23 : f32 to vector<1x32xf32>
    %33 = vector.extract_strided_slice %31 {offsets = [0, 0], sizes = [7, 32], strides = [1, 1]} : vector<8x32xf32> to vector<7x32xf32>
    %34 = tpu.concatenate %32, %33 in 0 : vector<1x32xf32>, vector<7x32xf32> -> vector<8x32xf32>
    %35 = vector.extract_strided_slice %31 {offsets = [1, 0], sizes = [7, 32], strides = [1, 1]} : vector<8x32xf32> to vector<7x32xf32>
    %36 = tpu.concatenate %35, %32 in 0 : vector<7x32xf32>, vector<1x32xf32> -> vector<8x32xf32>
    %37 = tpu.concatenate %34, %31, %36 in 1 : vector<8x32xf32>, vector<8x32xf32>, vector<8x32xf32> -> vector<8x96xf32>
    %cst_24 = arith.constant dense<0.000000e+00> : vector<8x32xf32>
    %38 = tpu.matmul %37, %6, %cst_24 {dimension_numbers = #tpu.dot_dimension_numbers<[1], [0], [0], [1], [0, 0, 1, 1], [], []>} : vector<8x96xf32>, vector<96x32xf32>, vector<8x32xf32> -> vector<8x32xf32>
    %39 = vector.broadcast %12 : vector<1x32xf32> to vector<8x32xf32>
    %40 = arith.addf %38, %39 : vector<8x32xf32>
    %cst_25 = arith.constant dense<0.000000e+00> : vector<8x32xf32>
    %41 = tpu.matmul %40, %7, %cst_25 {dimension_numbers = #tpu.dot_dimension_numbers<[1], [0], [0], [1], [0, 0, 1, 1], [], []>} : vector<8x32xf32>, vector<32x32xf32>, vector<8x32xf32> -> vector<8x32xf32>
    %42 = vector.broadcast %13 : vector<1x32xf32> to vector<8x32xf32>
    %43 = arith.addf %41, %42 : vector<8x32xf32>
    %cst_26 = arith.constant 0.000000e+00 : f32
    %44 = vector.broadcast %cst_26 : f32 to vector<8x32xf32>
    %45 = arith.maximumf %43, %44 : vector<8x32xf32>
    %46 = vector.broadcast %14 : vector<1x32xf32> to vector<8x32xf32>
    %47 = arith.mulf %45, %46 : vector<8x32xf32>
    %cst_27 = arith.constant dense<0.000000e+00> : vector<8xf32>
    %48 = vector.multi_reduction <add>, %47, %cst_27 [1] : vector<8x32xf32> to vector<8xf32>
    %49 = vector.shape_cast %48 : vector<8xf32> to vector<8x1xf32>
    %50 = vector.broadcast %15 : vector<1x1xf32> to vector<8x1xf32>
    %51 = arith.addf %49, %50 : vector<8x1xf32>
    %52 = arith.negf %51 : vector<8x1xf32>
    %53 = math.exp %52 : vector<8x1xf32>
    %cst_28 = arith.constant 1.000000e+00 : f32
    %54 = vector.broadcast %cst_28 : f32 to vector<8x1xf32>
    %55 = arith.addf %54, %53 : vector<8x1xf32>
    %56 = arith.divf %54, %55 : vector<8x1xf32>
    %57 = vector.shape_cast %56 : vector<8x1xf32> to vector<8x1xf32>
    %58 = vector.broadcast %57 : vector<8x1xf32> to vector<8x64xf32>
    %59 = tpu.concatenate %40, %23, %58 in 1 : vector<8x32xf32>, vector<8x32xf32>, vector<8x64xf32> -> vector<8x128xf32>
    %c0_29 = arith.constant 0 : index
    %c0_30 = arith.constant 0 : index
    %c0_31 = arith.constant 0 : index
    %60 = vector.load %arg4[%c0_29, %c0_30, %c0_31] : memref<1x8x128xf32, #tpu.memory_space<vmem>>, vector<1x8x128xf32>
    %61 = vector.shape_cast %60 : vector<1x8x128xf32> to vector<8x128xf32>
    %62 = vector.shape_cast %59 : vector<8x128xf32> to vector<1x8x128xf32>
    tpu.vector_store %arg4[%c0_29, %c0_30, %c0_31], %62 {strides = array<i32>} : memref<1x8x128xf32, #tpu.memory_space<vmem>>, vector<1x8x128xf32>,
    return
  }
  func.func @transform_0(%arg0: i32) -> (i32, i32, i32) {
    %c0_i32 = arith.constant 0 : i32
    %c0_i32_0 = arith.constant 0 : i32
    %c0_i32_1 = arith.constant 0 : i32
    return %arg0, %c0_i32, %c0_i32_0 : i32, i32, i32
  }
  func.func @transform_1(%arg0: i32) -> (i32, i32) {
    %c0_i32 = arith.constant 0 : i32
    %c0_i32_0 = arith.constant 0 : i32
    %c0_i32_1 = arith.constant 0 : i32
    return %c0_i32, %c0_i32_0 : i32, i32
  }
  func.func @transform_2(%arg0: i32) -> (i32, i32) {
    %c0_i32 = arith.constant 0 : i32
    %c0_i32_0 = arith.constant 0 : i32
    %c0_i32_1 = arith.constant 0 : i32
    return %c0_i32, %c0_i32_0 : i32, i32
  }
  func.func @transform_3(%arg0: i32) -> (i32, i32, i32) {
    %c0_i32 = arith.constant 0 : i32
    %c0_i32_0 = arith.constant 0 : i32
    %c0_i32_1 = arith.constant 0 : i32
    return %arg0, %c0_i32, %c0_i32_0 : i32, i32, i32
  }
}

</mosaic_0001>

<bundles_post_ra>
// kernel: tpu_custom_call.1
= control target key start
LH: loop header
LB: loop body
LE: loop exit
PB: predicated region body
PF: predicated region fallthrough
CT: control target
= control target key end

     0   :  { %8 = vsyncpa [#allocation3], 0  ;;  %s1371_s0 = inlined_call_operand.vmem [shape: f32[2,8,16], index: 0, kind: input, shape index: {}]   ;;  %s1372_s1 = inlined_call_operand.vmem [shape: f32[240,32], index: 1, kind: input, shape index: {}]   ;;  %s1373_s2 = inlined_call_operand.vmem [shape: f32[8,32], index: 2, kind: input, shape index: {}]   ;;  %s1374_s3 = inlined_call_operand.hbm [shape: f32[2,8,128], index: 3, kind: output, shape index: {}]  }
   0x1   :  { %10 = vsyncpa [#allocation3 + $0x1], 0  ;;  %s1121_s12 = smov 0   ;;  %s1123_s13 = smov 0  }
   0x2   :  { %s1125_s14 = smov 0   ;;  %s1127_s15 = smov 0  }
   0x3 LB: > { %s1142_s16 = sadd.s32 4294967295, %s1092_s15   ;;  %s795_s17 = sadd.s32 4294967294, %s1092_s15   ;;  %s1092_s15 = sphi %s1127_s15, %s1380_s15   ;;  %s1088_s14 = sphi %s1125_s14, %s1379_s14   ;;  %s1084_s13 = sphi %s1123_s13, %s1378_s13   ;;  %s1080_s12 = sphi %s1121_s12, %s1377_s12  }
   0x4   : > { %s1146_s18 = sadd.s32 1, %s1092_s15   ;;  %s91_s19 = sadd.s32 1, %s1088_s14 }
   0x5   : > { %s88_s20 = ssub.s32 %s1092_s15, %s1146_s18  ;;  %p101_p0 = scmp.ne.s32.totalorder %s1088_s14, %s1084_s13 }
   0x6   : > { %p89_p1 = scmp.eq.s32.totalorder %s88_s20, 0  ;;  %p102_p2 = scmp.eq.s32.totalorder %s1142_s16, 1 }
   0x7   : > { %p107_p3 = scmp.ne.s32.totalorder %s1084_s13, %s1080_s12  ;;  %p108_p4 = scmp.eq.s32.totalorder %s795_s17, 1 }
   0x8   : > { %s1157_s21 = scalar_select %p89_p1, %s1088_s14, %s91_s19  }
   0x9   : > { %p1159_p5 = por %p102_p2, %p101_p0  ;;  %p1163_p6 = por %p108_p4, %p107_p3 }
   0xa   : > { %p798_p7 = scmp.ge.s32.totalorder %s1092_s15, 1  ;;  %p139_p8 = scmp.lt.s32.totalorder %s1092_s15, 3 }
   0xc   : > { %p140_p9 = pnand %p798_p7, %p139_p8 }
   0xd   : > { %v167_v0 = vld [vmem:[%s1372_s1] sm:$0xff] (!%p140_p9)  ;;  %v168_v1 = vld [vmem:[%s1372_s1 + $0x8] sm:$0xff] (!%p140_p9)  ;;  %p162_p10 = scmp.lt.s32.totalorder (!%p140_p9), %s1142_s16, 1  ;;  %v1094_v2 = vmov (!%p140_p9), 0.0|0.0   ;;  %vm1095_vm0 = vmmov (!%p140_p9), 0   ;;  %v1096_v4 = vmov (!%p140_p9), 0.0  }
   0xe   : > { %143 = sbr.rel (%p140_p9) target bundleno = 1752 (0x6d8), region = 32  ;;  %934 = vmatprep.subr.bf16.mxu1 (!%p140_p9), %v1094_v2  ;;  %v935_v3 = vpack.c.bf16 (!%p140_p9), %v168_v1, %v167_v0  ;;  %860 = vmatprep.mubr.msk.f32.mxu1 (!%p140_p9), %vm1095_vm0, %v1096_v4  ;;  %v169_v5 = vld [vmem:[%s1372_s1 + $0x10] sm:$0xff] (!%p140_p9)  ;;  %v170_v6 = vld [vmem:[%s1372_s1 + $0x18] sm:$0xff] (!%p140_p9)  ;;  %vm209_vm1 = vcmask (!%p140_p9), 130048   ;;  %v171_v9 = vld [vmem:[%s1372_s1 + $0x20] sm:$0xff] (!%p140_p9)  ;;  %vm288_vm2 = vcmask (!%p140_p9), 261120  }
   0xf   : > { %943 = vmatprep.subr.bf16.mxu0 (!%p140_p9), %v1094_v2  ;;  %882 = vmatprep.mubr.msk.f32.mxu0 (!%p140_p9), %vm1095_vm0, %v1096_v4  ;;  %v938_v7 = vpack.c.bf16 (!%p140_p9), %v170_v6, %v169_v5  ;;  %v172_v10 = vld [vmem:[%s1372_s1 + $0x28] sm:$0xff] (!%p140_p9)  ;;  %v173_v12 = vld [vmem:[%s1372_s1 + $0x30] sm:$0xff] (!%p140_p9)  ;;  %v174_v13 = vld [vmem:[%s1372_s1 + $0x38] sm:$0xff] (!%p140_p9)  ;;  %vm524_vm3 = vcmask (!%p140_p9), 1046528   ;;  %s1097_s17 = smov (!%p140_p9), 32   ;;  %s1098_s19 = smov (!%p140_p9), 64  }
  0x10   : > { %936 = vmatpush3.bf16.msra.mxu1 (!%p140_p9), %v935_v3  ;;  %v941_v11 = vpack.c.bf16 (!%p140_p9), %v172_v10, %v171_v9  ;;  %v944_v14 = vpack.c.bf16 (!%p140_p9), %v174_v13, %v173_v12  ;;  %v801_v15 = vld [vmem:[%s1373_s2] ss:$0 sm:$0xff] (!%p140_p9)  ;;  %v176_v21 = vld [vmem:[%s1372_s1 + $0x48] sm:$0xff] (!%p140_p9)  ;;  %v177_v23 = vld [vmem:[%s1372_s1 + $0x50] sm:$0xff] (!%p140_p9)  ;;  %vm520_vm4 = vcmask (!%p140_p9), 1040384   ;;  %vm534_vm5 = vcmask (!%p140_p9), 523264  }
  0x11   : > { %937 = vmatprep.subr.bf16.mxu1 (!%p140_p9), %v1094_v2  ;;  %v175_v20 = vld [vmem:[%s1372_s1 + $0x40] sm:$0xff] (!%p140_p9)  ;;  %v178_v24 = vld [vmem:[%s1372_s1 + $0x58] sm:$0xff] (!%p140_p9)  ;;  %v180_v31 = vld [vmem:[%s1372_s1 + $0x68] sm:$0xff] (!%p140_p9)  ;;  %vm540_vm6 = vcmask (!%p140_p9), 785408   ;;  %s159_s8 = sand.u32 (!%p140_p9), 1, %s1084_s13   ;;  %s817_s10 = sshll.u32 (!%p140_p9), %s1142_s16, 7 }
  0x12   : > { %945 = vmatpush3.bf16.msra.mxu0 (!%p140_p9), %v944_v14  ;;  %v947_v22 = vpack.c.bf16 (!%p140_p9), %v176_v21, %v175_v20  ;;  %v950_v25 = vpack.c.bf16 (!%p140_p9), %v178_v24, %v177_v23  ;;  %v803_v26 = vld [vmem:[%s1373_s2 + $0x1] ss:$0 sm:$0xff] (!%p140_p9)  ;;  %v805_v33 = vld [vmem:[%s1373_s2 + $0x2] ss:$0 sm:$0xff] (!%p140_p9)  ;;  %v181_v38 = vld [vmem:[%s1372_s1 + $0x70] sm:$0xff] (!%p140_p9)  ;;  %s1328_s24 = scalar_lea.hbm (!%p140_p9), %s1374_s3, %s817_s10  ;;  %s1100_s26 = smov (!%p140_p9), [#allocation2]  }
  0x13   : > { %946 = vmatprep.subr.bf16.mxu0 (!%p140_p9), %v1094_v2  ;;  %v179_v30 = vld [vmem:[%s1372_s1 + $0x60] sm:$0xff] (!%p140_p9)  ;;  %v182_v39 = vld [vmem:[%s1372_s1 + $0x78] sm:$0xff] (!%p140_p9)  ;;  %v184_v42 = vld [vmem:[%s1372_s1 + $0x88] sm:$0xff] (!%p140_p9)  ;;  %s1034_s27 = sshll.u32 (!%p140_p9), %s1100_s26, 4  ;;  %s1035_s27 = int_to_ptr.vmem [resolvable:$false] %s1034_s27 }
  0x14   : > { %v953_v32 = vpack.c.bf16 (!%p140_p9), %v180_v31, %v179_v30  ;;  %v183_v40 = vld [vmem:[%s1372_s1 + $0x80] sm:$0xff] (!%p140_p9)  ;;  %v956_v41 = vpack.c.bf16 (!%p140_p9), %v182_v39, %v181_v38  ;;  %v185_v44 = vld [vmem:[%s1372_s1 + $0x90] sm:$0xff] (!%p140_p9)  ;;  %v186_v45 = vld [vmem:[%s1372_s1 + $0x98] sm:$0xff] (!%p140_p9)  ;;  %s1036_s28 = scalar_lea.vmem (!%p140_p9), %s1035_s27, 256 }
  0x15   : > { %s163_s5 = scalar_select %p162_p10, %s1142_s16, 1  ;;  %v959_v43 = vpack.c.bf16 %v184_v42, %v183_v40  ;;  %v962_v46 = vpack.c.bf16 %v186_v45, %v185_v44  ;;  %v187_v47 = vld [vmem:[%s1372_s1 + $0xa0] sm:$0xff]  ;;  %v188_v48 = vld [vmem:[%s1372_s1 + $0xa8] sm:$0xff]  ;;  %v189_v50 = vld [vmem:[%s1372_s1 + $0xb0] sm:$0xff] }
  0x16   : > { %948 = vmatpush3.bf16.msra.mxu0 %v947_v22  ;;  %v965_v49 = vpack.c.bf16 %v188_v48, %v187_v47  ;;  %v190_v51 = vld [vmem:[%s1372_s1 + $0xb8] sm:$0xff]  ;;  %v191_v53 = vld [vmem:[%s1372_s1 + $0xc0] sm:$0xff]  ;;  %v192_v54 = vld [vmem:[%s1372_s1 + $0xc8] sm:$0xff]  ;;  %v1099_v22 = vmov 0   ;;  %s723_s16 = scalar_lea.sflag [#allocation3], %s159_s8 }
  0x17   : > { %s800_s6 = sshll.u32 %s163_s5, 3  ;;  %955 = vmatprep.subr.bf16.mxu0 %v1094_v2  ;;  %v968_v52 = vpack.c.bf16 %v190_v51, %v189_v50  ;;  %v971_v55 = vpack.c.bf16 %v192_v54, %v191_v53  ;;  %v193_v56 = vld [vmem:[%s1372_s1 + $0xd0] sm:$0xff]  ;;  %v194_v57 = vld [vmem:[%s1372_s1 + $0xd8] sm:$0xff]  ;;  %v807_v58 = vld [vmem:[%s1373_s2 + $0x3] ss:$0 sm:$0xff]  ;;  %1024 = vset.pattern.permute.xlu1 %v1099_v22 }
  0x18   : > { %s165_s9 = scalar_lea.vmem %s1371_s0, %s800_s6  ;;  %v974_v59 = vpack.c.bf16 %v194_v57, %v193_v56  ;;  %v809_v10 = vld [vmem:[%s1373_s2 + $0x4] ss:$0 sm:$0xff]  ;;  %v811_v14 = vld [vmem:[%s1373_s2 + $0x5] ss:$0 sm:$0xff]  ;;  %1025 = vset.pattern.permute.xlu0 %v1099_v22  ;;  %v814_v23 = vld [vmem:[%s1373_s2 + $0x7] ss:$0 sm:$0xff] }
  0x19   : > { %v166_v8 = vld [vmem:[%s165_s9] sm:$0xff]  ;;  %s799_s9 = sshll.u32 %s159_s8, 3 }
  0x1a   : > { %861 = vmatmul.mubr.msk.f32.vlgmr.msra.gmra.mrb[0].mxu1 %vm209_vm1, %v166_v8  ;;  %v196_v8 = vld [vmem:[%s1372_s1 + $0xe8] sm:$0xff]  ;;  %s161_s11 = scalar_lea.vmem [#allocation2], %s799_s9 }
  0x1b   : > { %939 = vmatpush3.bf16.msra.mxu1 %v938_v7  ;;  %871 = vmatprep.mubr.msk.f32.mxu1 %vm1095_vm0, %v1096_v4 }
  0x1c   : > { %940 = vmatprep.subr.bf16.mxu1 %v1094_v2 }
  0x1f   : > { %942 = vmatpush3.bf16.msra.mxu1 %v941_v11 }
  0x20   : > { %949 = vmatprep.subr.bf16.mxu1 %v1094_v2 }
  0xed   : > { %v279_v16 = vpop.f32.mrb[0].mxu1 }
  0xee   : > { %v280_v17 = vadd.f32 %v801_v15, %v279_v16  ;;  %v862_v18 = vpop.f32.mrb[1].mxu1 }
  0xef   : > { %v813_v18 = vld [vmem:[%s1373_s2 + $0x6] ss:$0 sm:$0xff] }
  0xf0   : > { %v283_v19 = vmax.f32 %v280_v17, 0.0 }
  0xf2   : > { %872 = vmatmul.mubr.msk.f32.vlgmr.msra.gmra.mrb[2].mxu1 %vm288_vm2, %v283_v19 }
  0xf3   : > { %893 = vmatprep.mubr.msk.f32.mxu1 %vm1095_vm0, %v1096_v4  ;;  %951 = vmatpush3.bf16.msra.mxu1 %v950_v25 }
  0xf4   : > { %952 = vmatprep.subr.bf16.mxu1 %v1094_v2 }
  0xf7   : > { %954 = vmatpush3.bf16.msra.mxu1 %v953_v32 }
  0xf8   : > { %973 = vmatprep.subr.bf16.mxu1 %v1094_v2 }
 0x1c5   : > { %v358_v27 = vpop.f32.mrb[2].mxu1 }
 0x1c6   : > { %v359_v28 = vadd.f32 %v803_v26, %v358_v27  ;;  %v873_v29 = vpop.f32.mrb[3].mxu1 }
 0x1c8   : > { %883 = vmatmul.mubr.msk.f32.vlgmr.msra.gmra.mrb[0].mxu0 %vm288_vm2, %v359_v28 }
 0x1c9   : > { %920 = vmatprep.mubr.msk.f32.mxu0 %vm1095_vm0, %v1096_v4  ;;  %957 = vmatpush3.bf16.msra.mxu0 %v956_v41 }
 0x1ca   : > { %958 = vmatprep.subr.bf16.mxu0 %v1094_v2 }
 0x1cd   : > { %960 = vmatpush3.bf16.msra.mxu0 %v959_v43 }
 0x1ce   : > { %961 = vmatprep.subr.bf16.mxu0 %v1094_v2 }
 0x1d1   : > { %963 = vmatpush3.bf16.msra.mxu0 %v962_v46 }
 0x1d2   : > { %964 = vmatprep.subr.bf16.mxu0 %v1094_v2 }
 0x1d5   : > { %966 = vmatpush3.bf16.msra.mxu0 %v965_v49 }
 0x1d6   : > { %967 = vmatprep.subr.bf16.mxu0 %v1094_v2 }
 0x1d9   : > { %969 = vmatpush3.bf16.msra.mxu0 %v968_v52 }
 0x1da   : > { %970 = vmatprep.subr.bf16.mxu0 %v1094_v2 }
 0x1dd   : > { %972 = vmatpush3.bf16.msra.mxu0 %v971_v55 }
 0x29b   : > { %v435_v34 = vpop.f32.mrb[0].mxu0 }
 0x29c   : > { %v436_v35 = vadd.f32 %v805_v33, %v435_v34  ;;  %v884_v36 = vpop.f32.mrb[1].mxu0 }
 0x29e   : > { %v439_v37 = vmax.f32 %v436_v35, 0.0 }
 0x2a0   : > { %894 = vmatmul.mubr.msk.f32.vlgmr.msra.gmra.mrb[4].mxu1 %vm288_vm2, %v439_v37 }
 0x2a1   : > { %931 = vmatprep.mubr.msk.f32.mxu1 %vm1095_vm0, %v1096_v4  ;;  %975 = vmatpush3.bf16.msra.mxu1 %v974_v59 }
 0x2a2   : > { %976 = vmatprep.subr.bf16.mxu1 %v1094_v2  ;;  %v195_v2 = vld [vmem:[%s1372_s1 + $0xe0] sm:$0xff] }
 0x2a3   : > { %v977_v9 = vpack.c.bf16 %v196_v8, %v195_v2 }
 0x2a5   : > { %978 = vmatpush3.bf16.msra.mxu1 %v977_v9 }
 0x373   : > { %v513_v60 = vpop.f32.mrb[4].mxu1 }
 0x374   : > { %v514_v61 = vadd.f32 %v807_v58, %v513_v60  ;;  %v895_v62 = vpop.f32.mrb[5].mxu1 }
 0x376   : > { %526 = vrot.lane.b32.xlu0 %v514_v61, %s1097_s17  ;;  %v522_v63 = vrot.slane %v514_v61, 1  ;;  %v518_v1 = vrot.slane %v514_v61, 7 }
 0x378   : > { %v525_v0 = vsel %vm524_vm3, %v522_v63, 0.0  ;;  %v521_v4 = vsel %vm520_vm4, 0.0, %v518_v1 }
 0x37a   : > { %530 = vrot.lane.b32.xlu0 %v525_v0, %s1098_s19 }
 0x37e   : > { %716 = vrot.lane.b32.xlu0 %v359_v28, %s1097_s17  ;;  %s736_s17 = sshll.u32 %s161_s11, 4  ;;  %s1330_s17 = int_to_ptr.vmem [resolvable:$true] %s736_s17 }
 0x37f   : > { %s1030_s25 = scalar_lea.vmem %s1330_s17, 128  ;;  %p1037_p0 = scmp.lt.s32.totalorder %s1330_s17, %s1035_s27 }
 0x380   : > { %p1031_p11 = scmp.ne.s32.totalorder %s1330_s17, %s1030_s25  ;;  %p1038_p1 = scmp.lt.s32.totalorder %s1036_s28, %s1030_s25 }
 0x382   : > { %p1032_p12 = pnand %p1031_p11, %p1159_p5  ;;  %p1039_p2 = por %p1038_p1, %p1037_p0 }
 0x384   : > { %p1033_p13 = pneg %p1032_p12 }
 0x386   : > { %p1040_p3 = pnand %p1039_p2, %p1033_p13 }
 0x3e8   : > { %v527_v3 = vpop.permute.xlu0 %526 }
 0x3e9   : > { %v533_v5 = vsel %vm288_vm2, %v521_v4, %v527_v3 }
 0x3ec   : > { %v531_v6 = vpop.permute.xlu0 %530 }
 0x3ed   : > { %v535_v7 = vsel %vm534_vm5, %v533_v5, %v531_v6 }
 0x3ee   : > { %921 = vmatmul.mubr.msk.f32.vlgmr.msra.gmra.mrb[2].mxu0 %vm540_vm6, %v535_v7 }
 0x3f0   : > { %v717_v30 = vpop.permute.xlu0 %716 }
 0x4c1   : > { %v610_v11 = vpop.f32.mrb[2].mxu0 }
 0x4c2   : > { %v611_v12 = vadd.f32 %v809_v10, %v610_v11  ;;  %v922_v13 = vpop.f32.mrb[3].mxu0 }
 0x4c4   : > { %932 = vmatmul.mubr.msk.f32.vlgmr.msra.gmra.mrb[6].mxu1 %vm288_vm2, %v611_v12  ;;  %v719_v31 = vsel %vm288_vm2, %v611_v12, %v717_v30 }
 0x597   : > { %v687_v15 = vpop.f32.mrb[6].mxu1 }
 0x598   : > { %v688_v16 = vadd.f32 %v811_v14, %v687_v15  ;;  %v933_v17 = vpop.f32.mrb[7].mxu1 }
 0x59a   : > { %v691_v19 = vmax.f32 %v688_v16, 0.0 }
 0x59c   : > { %v696_v20 = vmul.f32 %v813_v18, %v691_v19 }
 0x59e   : > { %v697_v21 = vsel %vm288_vm2, %v696_v20, 0.0 }
 0x59f   : > { %698 = vadd.xlane.f32.xlu1 %v697_v21 }
 0x62c   : > { %v699_v24 = vpop.xlane.xlu1 %698 }
 0x62d   : > { %v704_v25 = vadd.f32 %v814_v23, %v699_v24 }
 0x62f   : > { %v815_v26 = vmul.f32 -1.442695, %v704_v25 }
 0x631   : > { %1026 = vpow2.f32 %v815_v26 }
 0x63b   : > { %v1027_v27 = vpop.eup %1026 }
 0x63c   : > { %v708_v28 = vadd.f32 1.0, %v1027_v27 }
 0x63e   : > { %1028 = vrcp.f32 %v708_v28 }
 0x648   : > { %v1029_v29 = vpop.eup %1028 }
 0x649   : > { %713 = vperm.xlu1 %1024, %v1029_v29  }
 0x6c8   : > { %v714_v32 = vpop.permute.xlu1 %713 }
 0x6c9   : > { %v720_v33 = vsel %vm534_vm5, %v719_v31, %v714_v32 }
 0x6ca   : > { %721 = vst [vmem:[%s161_s11] sm:$0xff] %v720_v33 }
 0x6cb   : > { %1043 = shalt.err (!%p1040_p3)
}
 0x6cc   : > { %s1044_s29 = scalar_lea.hbm %s1328_s24, 128  ;;  %s1048_s5 = scalar_lea.hbm %s1374_s3, 256 }
 0x6cd   : > { %p1045_p4 = scmp.ne.s32.totalorder %s1328_s24, %s1044_s29  ;;  %p1049_p9 = scmp.lt.u32.totalorder %s1328_s24, %s1374_s3 }
 0x6ce   : > { %p1050_p10 = scmp.lt.u32.totalorder %s1048_s5, %s1044_s29  ;;  %p1052_p12 = scmp.lt.u32.totalorder %s1044_s29, %s1328_s24 }
 0x6cf   : > { %p1046_p7 = pnand %p1045_p4, %p1159_p5 }
 0x6d0   : > { %p1051_p11 = por %p1050_p10, %p1049_p9 }
 0x6d1   : > { %p1047_p8 = pneg %p1046_p7 }
 0x6d2   : > { %p1053_p13 = por %p1052_p12, %p1051_p11 }
 0x6d4   : > { %p1054_p0 = pnand %p1053_p13, %p1047_p8 }
 0x6d6   : > { %1057 = shalt.err (!%p1054_p0)
}
 0x6d7   : > { %979 = dma.vmem_to_hbm [thread:$0]  (%p1159_p5), %s1330_s17, 128, %s1328_s24, %s723_s16  }
 0x6d8 PF: > { %p985_p1 = scmp.ge.s32.totalorder %s1092_s15, 2  ;;  %s748_s8 = sand.u32 1, %s1080_s12  }
 0x6d9   : > { %s749_s9 = scalar_lea.sflag [#allocation3], %s748_s8 }
 0x6da   : > { %p982_p2 = pnand %p985_p1, %p1163_p6 }
 0x6dc   : > { %1075 = dma.done.wait (!%p982_p2), %s749_s9, 128  }
 0x6dd   : > { %1077 = vsyncadd (!%p982_p2), %s749_s9, 4294967168  ;;  %p13_p3 = scmp.ge.s32.totalorder %s1146_s18, 4   ;;  %s1377_s12 = smov %s1084_s13 }
 0x6de   : > { %s1378_s13 = smov %s1088_s14  ;;  %s1379_s14 = smov %s1157_s21 }
 0x6df   : > { %s1380_s15 = smov %s1146_s18  ;;  %15 = sbr.rel (!%p13_p3) target bundleno = 3 (0x3), region = 67 }
 0x6e6   :  { %754 = vsyncpa [#allocation3], 1 }
 0x6e7   :  { %756 = vsyncpa [#allocation3 + $0x1], 1 }

</bundles_post_ra>
